<compile_context>
chip_gen: v7x
topology: tpu7x:2x2x1
jax: 0.10.0
libtpu: 0.0.40
codegen_flags: <defaults>
</compile_context>

<pallas_src>
import functools

import jax
import jax.numpy as jnp
from jax.experimental import pallas as pl
from jax.experimental.pallas import tpu as pltpu


# ---------------------------------------------------------------------------
# tiling configuration
# ---------------------------------------------------------------------------

_TILE_BUDGET_BYTES = 40 * 1024 * 1024   # double-buffered block budget (v7x-safe)
_VMEM_LIMIT_BYTES = 48 * 1024 * 1024    # explicit scoped-VMEM limit
_MAX_TILE_ELEMS = 32768                 # per-channel spatial elements per tile


# ---------------------------------------------------------------------------
# helpers (traced inside the kernels); channel axis is always axis=1
# ---------------------------------------------------------------------------

def _softmax_c(x):
    m = jnp.max(x, axis=1, keepdims=True)
    e = jnp.exp(x - m)
    s = jnp.sum(e, axis=1, keepdims=True)
    return e * pl.reciprocal(s, approx=True)


# ---------------------------------------------------------------------------
# kernels (blocks are (1, C, T) or (1, C, TH, W); channel reduction = axis 1)
# ---------------------------------------------------------------------------

def entropy_heart_kernel(x_ref, o_ref):
    # H = -sum_c p_c log p_c, p = softmax(x)
    #   = log(sum_c e^z_c) - (1/sum_c e^z_c) * sum_c e^z_c * z_c,  z = x - max
    x = x_ref[...].astype(jnp.float32)
    m = jnp.max(x, axis=1, keepdims=True)
    z = x - m
    e = jnp.exp(z)
    s = jnp.sum(e, axis=1, keepdims=True)
    inv = pl.reciprocal(s, approx=True)
    o_ref[...] = jnp.log(s) - inv * jnp.sum(e * z, axis=1, keepdims=True)


def entropy_sigmoid_kernel(x_ref, o_ref):
    # entr(sigmoid(x)) = sigmoid(x) * softplus(-x); softplus(-x) computed stably
    x = x_ref[...].astype(jnp.float32)
    p = jax.nn.sigmoid(x)
    softplus_negx = jnp.maximum(-x, 0.0) + jnp.log1p(jnp.exp(-jnp.abs(x)))
    o_ref[...] = jnp.sum(p * softplus_negx, axis=1, keepdims=True)


def ce_heart_kernel(xa_ref, xb_ref, o_ref):
    # CrossEntropyLoss(reduction='none') with soft targets softmax(xb):
    #   loss = -sum_c t_c * log_softmax(xa)_c
    #        = inv_b * (lse_a * sum_c e^zb_c - sum_c e^zb_c * za_c)
    xa = xa_ref[...].astype(jnp.float32)
    xb = xb_ref[...].astype(jnp.float32)
    ma = jnp.max(xa, axis=1, keepdims=True)
    za = xa - ma
    sa = jnp.sum(jnp.exp(za), axis=1, keepdims=True)
    lse_a = jnp.log(sa)
    mb = jnp.max(xb, axis=1, keepdims=True)
    eb = jnp.exp(xb - mb)
    sb = jnp.sum(eb, axis=1, keepdims=True)
    inv_b = pl.reciprocal(sb, approx=True)
    o_ref[...] = inv_b * (lse_a * sb - jnp.sum(eb * za, axis=1, keepdims=True))


def ce_binary_kernel(xa_ref, xb_ref, o_ref):
    # BCEWithLogitsLoss(reduction='none') with target sigmoid(xb) (per-channel)
    xa = xa_ref[...].astype(jnp.float32)
    xb = xb_ref[...].astype(jnp.float32)
    t = jax.nn.sigmoid(xb)
    o_ref[...] = jnp.maximum(xa, 0.0) - xa * t + jnp.log1p(jnp.exp(-jnp.abs(xa)))


def mse_kernel(xa_ref, xb_ref, o_ref, *, heart):
    # x = m(x); x -= x.min(dim=1); x /= x.sum(dim=1); mean((xa-xb)^2, dim=1)
    def norm(x):
        p = _softmax_c(x) if heart else jax.nn.sigmoid(x)
        p = p - jnp.min(p, axis=1, keepdims=True)
        # NOTE: denominator can be exactly 0 (e.g. C == 1 sigmoid path) -> NaN,
        # matching the PyTorch reference; keep the exact divide here.
        return p / jnp.sum(p, axis=1, keepdims=True)

    pa = norm(xa_ref[...].astype(jnp.float32))
    pb = norm(xb_ref[...].astype(jnp.float32))
    d = pa - pb
    o_ref[...] = jnp.mean(d * d, axis=1, keepdims=True)


# ---------------------------------------------------------------------------
# wrapper (== UMapGenerator(method, net_out).forward(x, batch_size))
# ---------------------------------------------------------------------------

def umap_generator(x, method: str, net_out: str, batch_size: int = 1,
                   *, max_tile_elems: int = _MAX_TILE_ELEMS):
    if method == 'none':
        return None
    if method == 'kl_divergence':
        # TODO(synk): reference module calls self.kl, which is never defined in
        # __init__ (would raise AttributeError in PyTorch) -- no semantics to copy.
        raise NotImplementedError('kl_divergence path is undefined in the reference module')

    N, C, H, W = x.shape
    B = batch_size
    HW = H * W
    heart = (net_out == 'heart')

    if method == 'entropy':
        assert N >= B, f'need at least {B} samples, got {N}'
        n_in = 1
        kernel = entropy_heart_kernel if heart else entropy_sigmoid_kernel
        out_c = 1
    elif method == 'cross_entropy':
        assert N >= 2 * B, f'expected stacked (pred, target) batch, got N={N}, batch_size={B}'
        n_in = 2
        if heart:
            kernel, out_c = ce_heart_kernel, 1
        else:
            kernel, out_c = ce_binary_kernel, C
    elif method == 'mse':
        assert N >= 2 * B, f'expected stacked (pred, target) batch, got N={N}, batch_size={B}'
        n_in = 2
        kernel = functools.partial(mse_kernel, heart=heart)
        out_c = 1
    else:
        raise ValueError(f'unknown method {method!r}')

    # --- spatial tile size from a VMEM budget (double-buffered f32 blocks) ---
    rows = 2 * (n_in * C + out_c)
    budget_elems = max(128, min(max_tile_elems, _TILE_BUDGET_BYTES // (rows * 4)))

    # --- layout choice: dense (H, W) tile if C would waste sublanes ---------
    packing = max(1, 4 // max(1, x.dtype.itemsize))     # sublanes per vreg / 8
    sublanes = 8 * packing
    use_spatial = (C < sublanes) and (W % 128 == 0)

    if use_spatial:
        th = max(8, (max(1, budget_elems // W) // 8) * 8)
        TH = H if th >= H else th
        grid = (B, pl.cdiv(H, TH))
        block_in, block_out = (1, C, TH, W), (1, out_c, TH, W)
        idx_a = lambda i, j: (i, 0, j, 0)
        idx_b = lambda i, j: (i + B, 0, j, 0)
        x_k = x                                    # stays NCHW
        out_shape = (B, out_c, H, W)
    else:
        t = max(128, (budget_elems // 128) * 128)
        T = HW if t >= HW else t
        grid = (B, pl.cdiv(HW, T))
        block_in, block_out = (1, C, T), (1, out_c, T)
        idx_a = lambda i, j: (i, 0, j)
        idx_b = lambda i, j: (i + B, 0, j)
        x_k = x.reshape(N, C, HW)                  # metadata-only reshape
        out_shape = (B, out_c, HW)

    # Pass the stacked array itself (twice for 2-input losses) instead of
    # materializing x[:B] / x[B:] slices in HBM.
    in_specs = [pl.BlockSpec(block_in, idx_a)]
    args = (x_k,)
    if n_in == 2:
        in_specs.append(pl.BlockSpec(block_in, idx_b))
        args = (x_k, x_k)

    out = pl.pallas_call(
        kernel,
        out_shape=jax.ShapeDtypeStruct(out_shape, jnp.float32),
        grid_spec=pltpu.PrefetchScalarGridSpec(
            num_scalar_prefetch=0,
            grid=grid,
            in_specs=in_specs,
            out_specs=pl.BlockSpec(block_out, idx_a),
        ),
        compiler_params=pltpu.CompilerParams(
            dimension_semantics=("parallel", "parallel"),
            vmem_limit_bytes=_VMEM_LIMIT_BYTES,
        ),
    )(*args)

    umap = out.reshape(B, out_c, H, W)
    assert umap.shape[1] == 1, f'umap shape is {umap.shape}, but should be (n, 1, h, w)'
    return umap


# ---------------------------------------------------------------------------
# pure-JAX reference (mirrors the PyTorch module) for sanity checking
# ---------------------------------------------------------------------------

def _umap_reference(x, method, net_out, batch_size):
    B = batch_size
    m = (lambda v: jax.nn.softmax(v, axis=1)) if net_out == 'heart' else jax.nn.sigmoid
    if method == 'entropy':
        p = m(x[:B])
        entr = jnp.where(p > 0, -p * jnp.log(jnp.where(p > 0, p, 1.0)), 0.0)
        return jnp.sum(entr, axis=1, keepdims=True)
    if method == 'cross_entropy':
        if net_out == 'heart':
            t = jax.nn.softmax(x[B:], axis=1)
            logp = jax.nn.log_softmax(x[:B], axis=1)
            return -jnp.sum(t * logp, axis=1, keepdims=True)
        xa = x[:B]
        t = jax.nn.sigmoid(x[B:])
        return jnp.maximum(xa, 0.0) - xa * t + jnp.log1p(jnp.exp(-jnp.abs(xa)))
    if method == 'mse':
        p = m(x)
        p = p - jnp.min(p, axis=1, keepdims=True)
        p = p / jnp.sum(p, axis=1, keepdims=True)
        return jnp.mean((p[:B] - p[B:]) ** 2, axis=1, keepdims=True)
    raise ValueError(method)


# ---------------------------------------------------------------------------

if __name__ == "__main__":
    key = jax.random.PRNGKey(0)
    k1, k2, k3 = jax.random.split(key, 3)

    B = 2
    # stacked inputs: first B samples are predictions, last B are "targets"
    x_heart = jax.random.normal(k1, (2 * B, 4, 16, 16), dtype=jnp.float32)   # flat layout
    x_bin = jax.random.normal(k2, (2 * B, 1, 16, 16), dtype=jnp.float32)     # flat layout, sigmoid
    x_wide = jax.random.normal(k3, (2 * B, 4, 16, 128), dtype=jnp.float32)   # dense-spatial layout

    cases = []
    for method in ('entropy', 'cross_entropy', 'mse'):
        cases.append((x_heart, method, 'heart'))
        cases.append((x_bin, method, 'other'))
        cases.append((x_wide, method, 'heart'))

    for xin, method, net_out in cases:
        got = umap_generator(xin, method, net_out, batch_size=B)
        jax.block_until_ready(got)
        _, c, h, w = xin.shape
        assert got.shape == (B, 1, h, w), (method, net_out, got.shape)
        # mse with C==1 sigmoid path is NaN by construction (matches PyTorch) -> skip compare
        if not (method == 'mse' and net_out != 'heart' and c == 1):
            ref = _umap_reference(xin, method, net_out, B)
            assert jnp.allclose(got, ref, rtol=1e-2, atol=1e-2), (method, net_out)

    # exercise the multi-tile grid paths explicitly (small tile override)
    tiled_flat = umap_generator(x_heart, 'entropy', 'heart', batch_size=B, max_tile_elems=128)
    full_flat = umap_generator(x_heart, 'entropy', 'heart', batch_size=B)
    assert jnp.allclose(tiled_flat, full_flat, rtol=1e-3, atol=1e-3)

    tiled_sp = umap_generator(x_wide, 'cross_entropy', 'heart', batch_size=B, max_tile_elems=128)
    full_sp = umap_generator(x_wide, 'cross_entropy', 'heart', batch_size=B)
    assert jnp.allclose(tiled_sp, full_sp, rtol=1e-3, atol=1e-3)

    assert umap_generator(x_heart, 'none', 'heart', batch_size=B) is None

    jax.block_until_ready(tiled_sp)
    print("KERNEL_OK")
</pallas_src>

<mosaic_0001>
module attributes {stable_mosaic.version = 11 : i64} {
  func.func @entropy_heart_kernel(%arg0: i32, %arg1: i32, %arg2: memref<1x4x256xf32, #tpu.memory_space<vmem>>, %arg3: memref<1x1x256xf32, #tpu.memory_space<vmem>>) attributes {dimension_semantics = [#tpu.dimension_semantics<parallel>, #tpu.dimension_semantics<parallel>], iteration_bounds = array<i64: 2, 1>, scalar_prefetch = 0 : i64, scratch_operands = 0 : i64, tpu.core_type = #tpu.core_type<tc>, window_params = [{transform_indices = @transform_0, window_bounds = array<i64: 1, 4, 256>}, {transform_indices = @transform_1, window_bounds = array<i64: 1, 1, 256>}]} {
    %c0 = arith.constant 0 : index
    %c0_0 = arith.constant 0 : index
    %c0_1 = arith.constant 0 : index
    %0 = vector.load %arg2[%c0, %c0_0, %c0_1] : memref<1x4x256xf32, #tpu.memory_space<vmem>>, vector<1x4x256xf32>
    %cst = arith.constant dense<0xFF800000> : vector<1x256xf32>
    %1 = vector.multi_reduction <maximumf>, %0, %cst [1] : vector<1x4x256xf32> to vector<1x256xf32>
    %2 = vector.shape_cast %1 : vector<1x256xf32> to vector<1x1x256xf32>
    %3 = vector.broadcast %2 : vector<1x1x256xf32> to vector<1x4x256xf32>
    %4 = arith.subf %0, %3 : vector<1x4x256xf32>
    %5 = math.exp %4 : vector<1x4x256xf32>
    %cst_2 = arith.constant dense<0.000000e+00> : vector<1x256xf32>
    %6 = vector.multi_reduction <add>, %5, %cst_2 [1] : vector<1x4x256xf32> to vector<1x256xf32>
    %7 = vector.shape_cast %6 : vector<1x256xf32> to vector<1x1x256xf32>
    %8 = tpu.reciprocal %7 {approx = true} : vector<1x1x256xf32> -> vector<1x1x256xf32>
    %9 = math.log %7 : vector<1x1x256xf32>
    %10 = arith.mulf %5, %4 : vector<1x4x256xf32>
    %cst_3 = arith.constant dense<0.000000e+00> : vector<1x256xf32>
    %11 = vector.multi_reduction <add>, %10, %cst_3 [1] : vector<1x4x256xf32> to vector<1x256xf32>
    %12 = vector.shape_cast %11 : vector<1x256xf32> to vector<1x1x256xf32>
    %13 = arith.mulf %8, %12 : vector<1x1x256xf32>
    %14 = arith.subf %9, %13 : vector<1x1x256xf32>
    %c0_4 = arith.constant 0 : index
    %c0_5 = arith.constant 0 : index
    %c0_6 = arith.constant 0 : index
    %15 = vector.load %arg3[%c0_4, %c0_5, %c0_6] : memref<1x1x256xf32, #tpu.memory_space<vmem>>, vector<1x1x256xf32>
    tpu.vector_store %arg3[%c0_4, %c0_5, %c0_6], %14 {strides = array<i32>} : memref<1x1x256xf32, #tpu.memory_space<vmem>>, vector<1x1x256xf32>,
    return
  }
  func.func @transform_0(%arg0: i32, %arg1: i32) -> (i32, i32, i32) {
    %c0_i32 = arith.constant 0 : i32
    %c0_i32_0 = arith.constant 0 : i32
    return %arg0, %c0_i32, %arg1 : i32, i32, i32
  }
  func.func @transform_1(%arg0: i32, %arg1: i32) -> (i32, i32, i32) {
    %c0_i32 = arith.constant 0 : i32
    %c0_i32_0 = arith.constant 0 : i32
    return %arg0, %c0_i32, %arg1 : i32, i32, i32
  }
}

</mosaic_0001>

<bundles_post_ra>
// kernel: tpu_custom_call.1
= control target key start
LH: loop header
LB: loop body
LE: loop exit
PB: predicated region body
PF: predicated region fallthrough
CT: control target
= control target key end

     0   :  { %6 = vsyncpa [#allocation3], 0  ;;  %s745_s0 = inlined_call_operand.hbm [shape: f32[4,4,256], index: 0, kind: input, shape index: {}]   ;;  %s746_s1 = inlined_call_operand.hbm [shape: f32[2,1,256], index: 1, kind: output, shape index: {}]  }
   0x1   :  { %8 = vsyncpa [#allocation3 + $0x1], 0 }
   0x2   :  { %9 = vsyncpa [#allocation4], 0 }
   0x3   :  { %11 = vsyncpa [#allocation4 + $0x1], 0  ;;  %s566_s6 = smov 0   ;;  %s568_s7 = smov 0  }
   0x4   :  { %s570_s8 = smov 0   ;;  %s572_s9 = smov 0  }
   0x5   :  { %s574_s10 = smov 0   ;;  %s576_s11 = smov 0  }
   0x6 LB: > { %s348_s12 = sadd.s32 4294967295, %s551_s11   ;;  %s349_s13 = sadd.s32 4294967294, %s551_s11   ;;  %s551_s11 = sphi %s576_s11, %s17_s11   ;;  %s547_s10 = sphi %s574_s10, %s762_s10   ;;  %s543_s9 = sphi %s572_s9, %s761_s9   ;;  %s539_s8 = sphi %s570_s8, %s760_s8   ;;  %s535_s7 = sphi %s568_s7, %s759_s7   ;;  %s531_s6 = sphi %s566_s6, %s758_s6  }
   0x7   : > { %s29_s14 = sadd.s32 1, %s547_s10  ;;  %s38_s15 = sadd.s32 1, %s539_s8 }
   0x8   : > { %p31_p0 = scmp.ge.s32.totalorder %s29_s14, 2  ;;  %p45_p1 = scmp.ne.s32.totalorder %s539_s8, %s535_s7 }
   0x9   : > { %p46_p2 = scmp.eq.s32.totalorder %s551_s11, 0  ;;  %p51_p3 = scmp.ne.s32.totalorder %s535_s7, %s531_s6 }
   0xa   : > { %s764_s14 = smov (%p31_p0, %s29_s14), 0  ;;  %p52_p5 = scmp.eq.s32.totalorder %s348_s12, 0 }
   0xb   : > { %p607_p4 = por %p46_p2, %p45_p1  ;;  %s33_s17 = ssub.s32 %s547_s10, %s764_s14 }
   0xc   : > { %p77_p6 = scmp.eq.s32.totalorder %s348_s12, 1  ;;  %p36_p7 = scmp.eq.s32.totalorder %s33_s17, 0 }
   0xd   : > { %p613_p8 = por %p52_p5, %p51_p3  ;;  %p83_p10 = scmp.eq.s32.totalorder %s349_s13, 1 }
   0xe   : > { %p617_p9 = por %p77_p6, %p45_p1  ;;  %p377_p13 = scmp.lt.s32.totalorder %s551_s11, 2 }
   0xf   : > { %s622_s20 = scalar_select %p36_p7, %s539_s8, %s38_s15  }
  0x10   : > { %s750_s19 = scalar_select %p617_p9, 1, 0 }
  0x11   : > { %p624_p11 = por %p83_p10, %p51_p3  ;;  %s103_s22 = sand.u32 1, %s539_s8  }
  0x12   : > { %s352_s23 = sshll.u32 %s103_s22, 3  ;;  %s363_s24 = sshll.u32 %s547_s10, 7 }
  0x13   : > { %s751_s21 = scalar_select %p624_p11, 1, 0 }
  0x14   : > { %s635_s27 = scalar_lea.hbm %s745_s0, %s363_s24  ;;  %s107_s28 = scalar_lea.vmem [#allocation2], %s352_s23 }
  0x15   : > { %s117_s29 = sshll.u32 %s107_s28, 4  ;;  %p641_p0 = pnand %p377_p13, %p607_p4  ;;  %s637_s29 = int_to_ptr.vmem [resolvable:$true] %s117_s29 }
  0x16   : > { %s104_s2 = scalar_lea.sflag [#allocation3], %s103_s22  ;;  %s439_s3 = scalar_lea.hbm %s635_s27, 128 }
  0x17   : > { %p440_p3 = scmp.ne.s32.totalorder %s635_s27, %s439_s3  ;;  %p441_p5 = pneg %p641_p0 }
  0x18   : > { %s444_s12 = scalar_lea.hbm %s745_s0, 512  ;;  %p445_p4 = scmp.lt.u32.totalorder %s635_s27, %s745_s0 }
  0x19   : > { %p442_p6 = pnand %p441_p5, %p440_p3  ;;  %p446_p10 = scmp.lt.u32.totalorder %s444_s12, %s439_s3 }
  0x1a   : > { %p448_p12 = scmp.lt.u32.totalorder %s439_s3, %s635_s27 }
  0x1b   : > { %p443_p7 = pneg %p442_p6  ;;  %p447_p13 = por %p446_p10, %p445_p4 }
  0x1d   : > { %p449_p1 = por %p448_p12, %p447_p13 }
  0x1f   : > { %p450_p2 = pnand %p449_p1, %p443_p7 }
  0x21   : > { %453 = shalt.err (!%p450_p2)
}
  0x22   : > { %s454_s16 = scalar_lea.vmem %s637_s29, 128  ;;  %s553_s17 = smov [#allocation2]  }
  0x23   : > { %p455_p3 = scmp.ne.s32.totalorder %s637_s29, %s454_s16  ;;  %s459_s22 = sshll.u32 %s553_s17, 4  ;;  %s460_s22 = int_to_ptr.vmem [resolvable:$false] %s459_s22 }
  0x24   : > { %s461_s23 = scalar_lea.vmem %s460_s22, 256  ;;  %p462_p9 = scmp.lt.s32.totalorder %s637_s29, %s460_s22 }
  0x25   : > { %p457_p6 = pnand %p455_p3, %p441_p5  ;;  %p463_p4 = scmp.lt.s32.totalorder %s461_s23, %s454_s16 }
  0x27   : > { %p458_p11 = pneg %p457_p6  ;;  %p464_p10 = por %p463_p4, %p462_p9 }
  0x29   : > { %p465_p12 = pnand %p464_p10, %p458_p11 }
  0x2b   : > { %468 = shalt.err (!%p465_p12)
}
  0x2c   : > { %372 = dma.hbm_to_vmem [thread:$0]  (!%p641_p0), %s635_s27, 128, %s637_s29, %s104_s2  }
  0x2d   : > { %p753_p1 = scmp.lt.s32.totalorder %s551_s11, 3  ;;  %p754_p2 = scmp.ge.s32.totalorder %s551_s11, 1 }
  0x2f   : > { %p123_p5 = pnand %p754_p2, %p753_p1 }
  0x30   : > { %s677_s24 = sand.u32 (!%p123_p5), 1, %s535_s7  }
  0x31   : > { %126 = sbr.rel (%p123_p5) target bundleno = 141 (0x8d), region = 24  ;;  %s356_s25 = sshll.u32 (!%p123_p5), %s677_s24, 3 }
  0x32   : > { %s129_s26 = scalar_lea.sflag (!%p123_p5), [#allocation3], %s677_s24  ;;  %s132_s28 = scalar_lea.vmem (!%p123_p5), [#allocation2], %s356_s25 }
  0x38   : > { %522 = dma.done.wait (%p613_p8), %s129_s26, 128  }
  0x39   : > { %524 = vsyncadd (%p613_p8), %s129_s26, 4294967168  ;;  %vm157_vm0 = vcmask 1043456   ;;  %v153_v0 = vld [vmem:[%s132_s28] sm:$0xff]  ;;  %v554_v50 = vmov 1966171168   ;;  %v230_v52 = vlaneseq  ;;  %s357_s18 = sshll.u32 %s677_s24, 1 }
  0x3a   : > { %v155_v1 = vcombine.high %v153_v0, %v153_v0  ;;  %v158_v2 = vsel %vm157_vm0, %v153_v0, -inf  ;;  %v228_v51 = vunpack.c.l.s4 %v554_v50  ;;  %s150_s27 = scalar_lea.vmem [#allocation5], %s357_s18  ;;  %s364_s30 = sshll.u32 %s543_s9, 5 }
  0x3b   : > { %v159_v3 = vrot.slane %v158_v2, 4  ;;  %v231_v60 = vshrl.u32 %v230_v52, 7  ;;  %s264_s29 = sshll.u32 %s150_s27, 4  ;;  %vm244_vm1 = vcmp.lt.s32.totalorder %v230_v52, 256  ;;  %s698_s4 = scalar_lea.hbm %s746_s1, %s364_s30  ;;  %s693_s29 = int_to_ptr.vmem [resolvable:$true] %s264_s29 }
  0x3c   : > { %v165_v4 = vsel %vm157_vm0, %v155_v1, -inf  ;;  %v229_v59 = vunpack.c.0.s8 %v228_v51  ;;  %s248_s5 = scalar_lea.sflag [#allocation4], %s677_s24  ;;  %s469_s12 = scalar_lea.vmem %s693_s29, 32 }
  0x3d   : > { %v160_v5 = vmax.f32 %v158_v2, %v159_v3  ;;  %v166_v6 = vrot.slane %v165_v4, 4  ;;  %p470_p8 = scmp.ne.s32.totalorder %s693_s29, %s469_s12  ;;  %p755_p9 = scmp.ne.s32.totalorder %s750_s19, 0 }
  0x3e   : > { %v232_v2 = vsub.s32 %v229_v59, %v231_v60  ;;  %s555_s9 = smov [#allocation5]  }
  0x3f   : > { %v161_v7 = vrot.slane %v160_v5, 2  ;;  %v167_v8 = vmax.f32 %v165_v4, %v166_v6  ;;  %p471_p11 = pnand %p470_p8, %p755_p9  ;;  %s473_s13 = sshll.u32 %s555_s9, 4  ;;  %s474_s13 = int_to_ptr.vmem [resolvable:$false] %s473_s13 }
  0x40   : > { %s475_s15 = scalar_lea.vmem %s474_s13, 64  ;;  %p476_p7 = scmp.lt.s32.totalorder %s693_s29, %s474_s13 }
  0x41   : > { %v162_v9 = vmax.f32 %v160_v5, %v161_v7  ;;  %v168_v10 = vrot.slane %v167_v8, 2  ;;  %p472_p0 = pneg %p471_p11  ;;  %p477_p13 = scmp.lt.s32.totalorder %s475_s15, %s469_s12 }
  0x43   : > { %v163_v11 = vrot.slane %v162_v9, 1  ;;  %v169_v12 = vmax.f32 %v167_v8, %v168_v10  ;;  %p478_p3 = por %p477_p13, %p476_p7 }
  0x45   : > { %v164_v13 = vmax.f32 %v162_v9, %v163_v11  ;;  %v170_v14 = vrot.slane %v169_v12, 1  ;;  %p479_p6 = pnand %p478_p3, %p472_p0 }
  0x47   : > { %v171_v15 = vmax.f32 %v169_v12, %v170_v14 }
  0x49   : > { %v174_v16 = vcombine.low %v164_v13, %v171_v15 }
  0x4b   : > { %v176_v17 = vsub.f32 %v153_v0, %v174_v16 }
  0x4d   : > { %v177_v18 = vmul.f32 1.442695, %v176_v17 }
  0x4f   : > { %429 = vpow2.f32 %v177_v18 }
  0x59   : > { %v430_v19 = vpop.eup %429 }
  0x5a   : > { %v202_v20 = vmul.f32 %v430_v19, %v176_v17  ;;  %v180_v21 = vcombine.high %v430_v19, %v430_v19  ;;  %v182_v22 = vsel %vm157_vm0, %v430_v19, 0.0 }
  0x5b   : > { %v183_v23 = vrot.slane %v182_v22, 4 }
  0x5c   : > { %v204_v24 = vcombine.high %v202_v20, %v202_v20  ;;  %v206_v25 = vsel %vm157_vm0, %v202_v20, 0.0  ;;  %v189_v26 = vsel %vm157_vm0, %v180_v21, 0.0 }
  0x5d   : > { %v207_v27 = vrot.slane %v206_v25, 4  ;;  %v184_v28 = vadd.f32 %v183_v23, %v182_v22  ;;  %v190_v29 = vrot.slane %v189_v26, 4 }
  0x5e   : > { %v213_v30 = vsel %vm157_vm0, %v204_v24, 0.0 }
  0x5f   : > { %v185_v31 = vrot.slane %v184_v28, 2  ;;  %v191_v32 = vadd.f32 %v190_v29, %v189_v26  ;;  %v208_v33 = vadd.f32 %v207_v27, %v206_v25  ;;  %v214_v34 = vrot.slane %v213_v30, 4 }
  0x61   : > { %v186_v35 = vadd.f32 %v185_v31, %v184_v28  ;;  %v192_v36 = vrot.slane %v191_v32, 2  ;;  %v215_v37 = vadd.f32 %v214_v34, %v213_v30  ;;  %v209_v38 = vrot.slane %v208_v33, 2 }
  0x63   : > { %v187_v39 = vrot.slane %v186_v35, 1  ;;  %v193_v40 = vadd.f32 %v192_v36, %v191_v32  ;;  %v216_v41 = vrot.slane %v215_v37, 2  ;;  %v210_v44 = vadd.f32 %v209_v38, %v208_v33 }
  0x65   : > { %v188_v42 = vadd.f32 %v187_v39, %v186_v35  ;;  %v194_v43 = vrot.slane %v193_v40, 1  ;;  %v217_v46 = vadd.f32 %v216_v41, %v215_v37  ;;  %v211_v47 = vrot.slane %v210_v44, 1 }
  0x67   : > { %v195_v45 = vadd.f32 %v194_v43, %v193_v40  ;;  %431 = vrcp.f32 %v188_v42  ;;  %v218_v48 = vrot.slane %v217_v46, 1  ;;  %v212_v49 = vadd.f32 %v211_v47, %v210_v44 }
  0x68   : > { %433 = vlog2.f32 %v188_v42 }
  0x69   : > { %435 = vrcp.f32 %v195_v45  ;;  %v219_v53 = vadd.f32 %v218_v48, %v217_v46 }
  0x6a   : > { %437 = vlog2.f32 %v195_v45 }
  0x71   : > { %v432_v54 = vpop.eup %431 }
  0x72   : > { %v434_v55 = vpop.eup %433  ;;  %v220_v56 = vmul.f32 %v432_v54, %v212_v49 }
  0x73   : > { %v436_v57 = vpop.eup %435  ;;  %v199_v58 = vmul.f32 0.6931472, %v434_v55 }
  0x74   : > { %v438_v61 = vpop.eup %437  ;;  %v221_v62 = vmul.f32 %v436_v57, %v219_v53 }
  0x75   : > { %v201_v63 = vmul.f32 0.6931472, %v438_v61  ;;  %v222_v0 = vsub.f32 %v199_v58, %v220_v56 }
  0x77   : > { %v223_v1 = vsub.f32 %v201_v63, %v221_v62 }
  0x79   : > { %v226_v3 = vcombine.low %v222_v0, %v223_v1 }
  0x7b   : > { %v233_v4 = vrot.slane %v226_v3, %v232_v2 }
  0x7d   : > { %v240_v5 = vrot.slane %v233_v4, %v232_v2 }
  0x7f   : > { %246 = vst.msk [vmem:[%s150_s27] sm:$0x3] %vm244_vm1, %v240_v5 }
  0x80   : > { %482 = shalt.err (!%p479_p6)
}
  0x81   : > { %s483_s16 = scalar_lea.hbm %s698_s4, 32  ;;  %s487_s23 = scalar_lea.hbm %s746_s1, 64 }
  0x82   : > { %p484_p4 = scmp.ne.s32.totalorder %s698_s4, %s483_s16  ;;  %p488_p1 = scmp.lt.u32.totalorder %s698_s4, %s746_s1 }
  0x83   : > { %p489_p2 = scmp.lt.u32.totalorder %s487_s23, %s483_s16  ;;  %p491_p8 = scmp.lt.u32.totalorder %s483_s16, %s698_s4 }
  0x84   : > { %p485_p10 = pnand %p484_p4, %p755_p9 }
  0x85   : > { %p490_p5 = por %p489_p2, %p488_p1 }
  0x86   : > { %p486_p12 = pneg %p485_p10 }
  0x87   : > { %p492_p11 = por %p491_p8, %p490_p5 }
  0x89   : > { %p493_p0 = pnand %p492_p11, %p486_p12 }
  0x8b   : > { %496 = shalt.err (!%p493_p0)
}
  0x8c   : > { %367 = dma.vmem_to_hbm [thread:$0]  (%p755_p9), %s693_s29, 32, %s698_s4, %s248_s5  }
  0x8d PF: > { %s276_s26 = sand.u32 1, %s531_s6   ;;  %p756_p7 = scmp.ne.s32.totalorder %s751_s21, 0 }
  0x8e   : > { %p757_p13 = scmp.ge.s32.totalorder %s551_s11, 2  ;;  %s277_s28 = scalar_lea.sflag [#allocation4], %s276_s26 }
  0x90   : > { %p374_p3 = pnand %p757_p13, %p756_p7 }
  0x92   : > { %526 = dma.done.wait (!%p374_p3), %s277_s28, 32  }
  0x93   : > { %528 = vsyncadd (!%p374_p3), %s277_s28, 4294967264  ;;  %s17_s11 = sadd.s32 1, %s551_s11   ;;  %s758_s6 = smov %s535_s7 }
  0x94   : > { %p14_p6 = scmp.ge.s32.totalorder %s17_s11, 4   ;;  %s759_s7 = smov %s539_s8 }
  0x95   : > { %s760_s8 = smov %s622_s20  ;;  %s761_s9 = smov %s547_s10 }
  0x96   : > { %s762_s10 = smov %s764_s14  ;;  %16 = sbr.rel (!%p14_p6) target bundleno = 6 (0x6), region = 69 }
  0x9d   :  { %282 = vsyncpa [#allocation3], 1 }
  0x9e   :  { %284 = vsyncpa [#allocation3 + $0x1], 1 }
  0x9f   :  { %285 = vsyncpa [#allocation4], 1 }
  0xa0   :  { %287 = vsyncpa [#allocation4 + $0x1], 1 }

</bundles_post_ra>
